<compile_context>
chip_gen: v7x
topology: tpu7x:2x2x1
jax: 0.10.0
libtpu: 0.0.40
codegen_flags: <defaults>
</compile_context>

<pallas_src>
import functools

import jax
import jax.numpy as jnp
from jax.experimental import pallas as pl
from jax.experimental.pallas import tpu as pltpu


def _row_sum_kernel(pred_ref, out_ref, *, block_c, num_classes, needs_class_mask):
    # pred_ref: (TM, TC) native dtype     out_ref: (TM, 1) f32 (resident over class axis)
    c = pl.program_id(1)

    @pl.when(c == 0)
    def _():
        out_ref[...] = jnp.zeros_like(out_ref)

    pred = pred_ref[...].astype(jnp.float32)
    if needs_class_mask:
        # Loop-invariant (1, block_c) lane iota; only the scalar threshold varies.
        lane = jax.lax.broadcasted_iota(jnp.int32, (1, block_c), 1)
        pred = jnp.where(lane < (num_classes - c * block_c), pred, 0.0)
    out_ref[...] += jnp.sum(pred, axis=-1, keepdims=True)


def _round_up(x, m):
    return (x + m - 1) // m * m


def label_smoothing_loss(pred, target, num_classes, smoothing=0.0, reduction="mean",
                         block_rows=256, block_classes=8192):
    """Matches LabelSmoothingLoss.forward (dim=-1 / dim=1 on 2-D pred)."""
    N, C = pred.shape
    assert C == num_classes

    itemsize = jnp.dtype(pred.dtype).itemsize
    rows_mult = 8 if itemsize >= 4 else (16 if itemsize == 2 else 32)

    # Row tile: sublane-multiple of the streamed dtype; keep >=2 row blocks when
    # possible so the parallel row axis can shard across v7x's two TensorCores.
    block_rows = int(block_rows)
    if N >= 2 * rows_mult:
        block_rows = min(block_rows, _round_up(pl.cdiv(N, 2), rows_mult))
    else:
        block_rows = _round_up(N, rows_mult)
    block_rows = max(rows_mult, min(block_rows, _round_up(N, rows_mult)))

    # Class tile: multiple of 128, capped. Class tail is masked in-kernel
    # (no jnp.pad of pred -> no extra full read+write of the logits).
    block_c = min(_round_up(C, 128), _round_up(int(block_classes), 128))
    needs_class_mask = (C % block_c) != 0

    grid = (pl.cdiv(N, block_rows), pl.cdiv(C, block_c))

    # VMEM budget: double-buffered pred tile + slack, capped for v7x (64 MiB).
    tile_bytes = block_rows * block_c * itemsize
    vmem_limit = int(min(48 * 1024 * 1024,
                         max(16 * 1024 * 1024, 2 * tile_bytes + (2 << 20))))

    kernel = functools.partial(
        _row_sum_kernel,
        block_c=int(block_c),
        num_classes=int(num_classes),
        needs_class_mask=bool(needs_class_mask),
    )

    row_sum = pl.pallas_call(
        kernel,
        out_shape=jax.ShapeDtypeStruct((N, 1), jnp.float32),
        grid_spec=pltpu.PrefetchScalarGridSpec(
            num_scalar_prefetch=0,
            grid=grid,
            in_specs=[
                # pred streamed in its native dtype, tiled over rows and classes
                pl.BlockSpec((block_rows, block_c), lambda i, c: (i, c)),
            ],
            # Output block index constant over the class axis -> VMEM-resident
            # f32 accumulator; no scratch needed.
            out_specs=pl.BlockSpec((block_rows, 1), lambda i, c: (i, 0)),
        ),
        compiler_params=pltpu.CompilerParams(
            dimension_semantics=("parallel", "arbitrary"),
            vmem_limit_bytes=vmem_limit,
        ),
    )(pred)[:, 0]

    # Tiny affine correction outside the kernel (gather of N elements).
    smooth_val = jnp.float32(smoothing / (num_classes - 1))
    confidence = jnp.float32(1.0 - smoothing)
    tgt = target.astype(jnp.int32)
    pred_t = jnp.take_along_axis(pred, tgt[:, None], axis=-1)[:, 0].astype(jnp.float32)
    per_row = -(smooth_val * row_sum + (confidence - smooth_val) * pred_t)

    if reduction == "mean":
        return jnp.mean(per_row)
    elif reduction == "none":
        return per_row
    else:
        raise RuntimeError("reduction mode not supported")


def _reference(pred, target, num_classes, smoothing, reduction):
    pred = pred.astype(jnp.float32)
    smooth_val = smoothing / (num_classes - 1)
    confidence = 1.0 - smoothing
    onehot = jax.nn.one_hot(target, num_classes, dtype=pred.dtype)
    true_dist = onehot * confidence + (1.0 - onehot) * smooth_val
    per_row = jnp.sum(-true_dist * pred, axis=-1)
    return jnp.mean(per_row) if reduction == "mean" else per_row


if __name__ == "__main__":
    key = jax.random.PRNGKey(0)
    k1, k2, k3, k4 = jax.random.split(key, 4)

    # --- Test 1: small aligned shapes, f32 ---
    N, C = 8, 128
    smoothing = 0.1
    logits = jax.random.normal(k1, (N, C), dtype=jnp.float32)
    pred = jax.nn.log_softmax(logits, axis=-1)
    target = jax.random.randint(k2, (N,), 0, C, dtype=jnp.int32)

    loss_mean = label_smoothing_loss(pred, target, C, smoothing, reduction="mean")
    loss_none = label_smoothing_loss(pred, target, C, smoothing, reduction="none")
    jax.block_until_ready((loss_mean, loss_none))
    assert jnp.allclose(loss_mean, _reference(pred, target, C, smoothing, "mean"),
                        atol=1e-4, rtol=1e-5)
    assert jnp.allclose(loss_none, _reference(pred, target, C, smoothing, "none"),
                        atol=1e-4, rtol=1e-5)

    # --- Test 2: unaligned shapes (exercise in-kernel class-tail mask + row tail), f32 ---
    N2, C2 = 37, 300
    smoothing2 = 0.2
    logits2 = jax.random.normal(k3, (N2, C2), dtype=jnp.float32)
    pred2 = jax.nn.log_softmax(logits2, axis=-1)
    target2 = jax.random.randint(k4, (N2,), 0, C2, dtype=jnp.int32)

    loss2_mean = label_smoothing_loss(pred2, target2, C2, smoothing2, reduction="mean")
    loss2_none = label_smoothing_loss(pred2, target2, C2, smoothing2, reduction="none")
    jax.block_until_ready((loss2_mean, loss2_none))
    assert jnp.allclose(loss2_mean, _reference(pred2, target2, C2, smoothing2, "mean"),
                        atol=1e-4, rtol=1e-5)
    assert jnp.allclose(loss2_none, _reference(pred2, target2, C2, smoothing2, "none"),
                        atol=1e-4, rtol=1e-5)

    # --- Test 3: bf16 pred streamed natively (no wrapper-side f32 upcast) ---
    pred_bf16 = pred.astype(jnp.bfloat16)
    loss_bf16 = label_smoothing_loss(pred_bf16, target, C, smoothing, reduction="mean")
    jax.block_until_ready(loss_bf16)
    assert jnp.allclose(loss_bf16,
                        _reference(pred_bf16.astype(jnp.float32), target, C, smoothing, "mean"),
                        atol=1e-3, rtol=1e-3)

    print("KERNEL_OK")
</pallas_src>

<mosaic_0001>
module attributes {stable_mosaic.version = 11 : i64} {
  func.func @_row_sum_kernel(%arg0: i32, %arg1: i32, %arg2: memref<8x128xf32, #tpu.memory_space<vmem>>, %arg3: memref<8x1xf32, #tpu.memory_space<vmem>>) attributes {dimension_semantics = [#tpu.dimension_semantics<parallel>, #tpu.dimension_semantics<arbitrary>], iteration_bounds = array<i64: 1, 1>, scalar_prefetch = 0 : i64, scratch_operands = 0 : i64, tpu.core_type = #tpu.core_type<tc>, window_params = [{transform_indices = @transform_0, window_bounds = array<i64: 8, 128>}, {transform_indices = @transform_1, window_bounds = array<i64: 8, 1>}]} {
    %c0_i32 = arith.constant 0 : i32
    %0 = arith.cmpi eq, %arg1, %c0_i32 : i32
    %1 = arith.extui %0 : i1 to i32
    %c0_i32_0 = arith.constant 0 : i32
    %2 = arith.cmpi ne, %1, %c0_i32_0 : i32
    scf.if %2 {
      %cst_6 = arith.constant 0.000000e+00 : f32
      %9 = vector.broadcast %cst_6 : f32 to vector<8x1xf32>
      %c0_7 = arith.constant 0 : index
      %c0_8 = arith.constant 0 : index
      %10 = vector.load %arg3[%c0_7, %c0_8] : memref<8x1xf32, #tpu.memory_space<vmem>>, vector<8x1xf32>
      tpu.vector_store %arg3[%c0_7, %c0_8], %9 {strides = array<i32>} : memref<8x1xf32, #tpu.memory_space<vmem>>, vector<8x1xf32>,
    } else {
    }
    %c0 = arith.constant 0 : index
    %c0_1 = arith.constant 0 : index
    %3 = vector.load %arg2[%c0, %c0_1] : memref<8x128xf32, #tpu.memory_space<vmem>>, vector<8x128xf32>
    %c0_2 = arith.constant 0 : index
    %c0_3 = arith.constant 0 : index
    %4 = vector.load %arg3[%c0_2, %c0_3] : memref<8x1xf32, #tpu.memory_space<vmem>>, vector<8x1xf32>
    %cst = arith.constant dense<0.000000e+00> : vector<8xf32>
    %5 = vector.multi_reduction <add>, %3, %cst [1] : vector<8x128xf32> to vector<8xf32>
    %6 = vector.shape_cast %5 : vector<8xf32> to vector<8x1xf32>
    %7 = arith.addf %4, %6 : vector<8x1xf32>
    %c0_4 = arith.constant 0 : index
    %c0_5 = arith.constant 0 : index
    %8 = vector.load %arg3[%c0_4, %c0_5] : memref<8x1xf32, #tpu.memory_space<vmem>>, vector<8x1xf32>
    tpu.vector_store %arg3[%c0_4, %c0_5], %7 {strides = array<i32>} : memref<8x1xf32, #tpu.memory_space<vmem>>, vector<8x1xf32>,
    return
  }
  func.func @transform_0(%arg0: i32, %arg1: i32) -> (i32, i32) {
    %c0_i32 = arith.constant 0 : i32
    return %arg0, %arg1 : i32, i32
  }
  func.func @transform_1(%arg0: i32, %arg1: i32) -> (i32, i32) {
    %c0_i32 = arith.constant 0 : i32
    %c0_i32_0 = arith.constant 0 : i32
    return %arg0, %c0_i32 : i32, i32
  }
}

</mosaic_0001>

<bundles_post_ra>
// kernel: tpu_custom_call.1
= control target key start
LH: loop header
LB: loop body
LE: loop exit
PB: predicated region body
PF: predicated region fallthrough
CT: control target
= control target key end

     0   :  { %6 = vsyncpa [#allocation3], 0  ;;  %s64_s6 = smov [#allocation2]   ;;  %s97_s0 = inlined_call_operand.hbm [shape: f32[8,128], index: 0, kind: input, shape index: {}]   ;;  %s98_s1 = inlined_call_operand.vmem [shape: f32[8,1], index: 1, kind: output, shape index: {}]  }
   0x1   :  { %s13_s7 = sshll.u32 %s64_s6, 4  ;;  %s40_s10 = scalar_lea.hbm %s97_s0, 128  ;;  %s14_s7 = int_to_ptr.vmem [resolvable:$true] %s13_s7 }
   0x2   :  { %p41_p0 = scmp.ne.s32.totalorder %s97_s0, %s40_s10  ;;  %p44_p1 = scmp.lt.u32.totalorder %s40_s10, %s97_s0 }
   0x4   :  { %p46_p2 = pnand %p44_p1, %p41_p0 }
   0x6   :  { %49 = shalt.err (!%p46_p2)
}
   0x7   :  { %s50_s15 = scalar_lea.vmem %s14_s7, 128  ;;  %p55_p4 = scmp.lt.s32.totalorder %s14_s7, %s14_s7 }
   0x8   :  { %p51_p3 = scmp.ne.s32.totalorder %s14_s7, %s50_s15  ;;  %p56_p5 = scmp.lt.s32.totalorder %s50_s15, %s50_s15 }
   0xa   :  { %p57_p6 = por %p56_p5, %p55_p4 }
   0xc   :  { %p58_p7 = pnand %p57_p6, %p51_p3 }
   0xe   :  { %61 = shalt.err (!%p58_p7)
}
   0xf   :  { %16 = dma.hbm_to_vmem [thread:$0]  %s97_s0, 128, %s14_s7, [#allocation3]  }
  0x10   :  { %62 = dma.done.wait [#allocation3], 128  }
  0x11   :  { %63 = vsyncadd [#allocation3], 4294967168  ;;  %vm24_vm0 = vcmask 7168   ;;  %v65_v0 = vmov 0.0   ;;  %v26_v1 = vld [vmem:[#allocation2] sm:$0xff] }
  0x12   :  { %25 = vst.msk [vmem:[%s98_s1] sm:$0xff] %vm24_vm0, %v65_v0  ;;  %28 = vadd.xlane.f32.xlu0 %v26_v1 }
  0x19   :  { %v27_v2 = vld [vmem:[%s98_s1] sm:$0xff] }
  0x9f   :  { %v29_v3 = vpop.xlane.xlu0 %28 }
  0xa0   :  { %v30_v4 = vadd.f32 %v29_v3, %v27_v2 }
  0xa2   :  { %32 = vst.msk [vmem:[%s98_s1] sm:$0xff] %vm24_vm0, %v30_v4 }
  0xa3   :  { %37 = vsyncpa [#allocation3], 1 }

</bundles_post_ra>
